<compile_context>
chip_gen: v5e
topology: v5e:2x2
jax: 0.10.0
libtpu: 0.0.40
codegen_flags: <defaults>
</compile_context>

<pallas_src>
import jax
import jax.numpy as jnp
from jax.experimental import pallas as pl
from jax.experimental.pallas import tpu as pltpu


_LANE = 128
_MAX_LANE_WIDTH = 2048                    # lane-dense last dim, large multiple of 128
_TILE_BYTES_BUDGET = 4 * 1024 * 1024      # per-tile cap; 4 double-buffered bufs fit v7x VMEM
_ROW_TILE_CANDIDATES = (2048, 1024, 512, 256, 128, 64, 32, 16, 8)


def _copy_kernel(x_ref, o_ref):
    # Pure pass-through of the current VMEM tile; fully hidden under HBM DMA.
    o_ref[...] = x_ref[...]


def _materialized_copy(x):
    """HBM-roofline-tuned identity copy (only used when a fresh buffer is required)."""
    n = x.size
    itemsize = jnp.dtype(x.dtype).itemsize

    if n % _LANE != 0:
        # Rare fallback: array not lane-divisible — single untiled full-array copy.
        return pl.pallas_call(
            _copy_kernel,
            out_shape=jax.ShapeDtypeStruct(x.shape, x.dtype),
        )(x)

    # Choose a lane-dense width: largest multiple of 128 dividing n, capped.
    w = _LANE
    while w * 2 <= _MAX_LANE_WIDTH and n % (w * 2) == 0:
        w *= 2
    rows = n // w

    # Choose the largest row tile (multiple of 8) that divides `rows` and fits
    # the per-tile VMEM budget; otherwise take the whole slab in one block.
    tr = rows
    for cand in _ROW_TILE_CANDIDATES:
        if rows % cand == 0 and cand * w * itemsize <= _TILE_BYTES_BUDGET:
            tr = cand
            break

    x2 = x.reshape(rows, w)
    spec = pl.BlockSpec((tr, w), lambda i: (i, 0))
    y2 = pl.pallas_call(
        _copy_kernel,
        out_shape=jax.ShapeDtypeStruct((rows, w), x.dtype),
        grid=(rows // tr,),
        in_specs=[spec],
        out_specs=spec,
        compiler_params=pltpu.CompilerParams(
            dimension_semantics=("parallel",),      # v7x: 2 TCs split the grid
            vmem_limit_bytes=32 * 1024 * 1024,      # headroom on v5e's 16 MiB scoped default
        ),
    )(x2)
    return y2.reshape(x.shape)


def data_id_layer(x, *args, materialize=False, **kwargs):
    """Forward pass of DataIDLayer (identity).

    Default path returns `x` directly — the fastest correct implementation
    (no HBM read/write at all). Pass materialize=True to force a fresh output
    buffer produced by the lane-dense Pallas copy kernel.
    """
    if not materialize:
        return x
    return _materialized_copy(x)


if __name__ == "__main__":
    key = jax.random.PRNGKey(0)
    x = jax.random.normal(key, (2, 4, 16, 16), dtype=jnp.float32)

    # 1) Default identity path: no kernel launch, zero HBM traffic.
    y_id = data_id_layer(x)
    jax.block_until_ready(y_id)
    assert y_id.shape == x.shape and y_id.dtype == x.dtype
    assert bool(jnp.array_equal(y_id, x))

    # 2) Materialized path: exercise the Pallas copy kernel once.
    y_copy = data_id_layer(x, materialize=True)
    jax.block_until_ready(y_copy)
    assert y_copy.shape == x.shape and y_copy.dtype == x.dtype
    assert bool(jnp.array_equal(y_copy, x))

    print("KERNEL_OK")
</pallas_src>

<mosaic_0001>
module attributes {stable_mosaic.version = 11 : i64} {
  func.func @_copy_kernel(%arg0: i32, %arg1: memref<1x2048xf32, #tpu.memory_space<vmem>>, %arg2: memref<1x2048xf32, #tpu.memory_space<vmem>>) attributes {dimension_semantics = [#tpu.dimension_semantics<parallel>], iteration_bounds = array<i64: 1>, scalar_prefetch = 0 : i64, scratch_operands = 0 : i64, tpu.core_type = #tpu.core_type<tc>, window_params = [{transform_indices = @transform_0, window_bounds = array<i64: 1, 2048>}, {transform_indices = @transform_1, window_bounds = array<i64: 1, 2048>}]} {
    %c0 = arith.constant 0 : index
    %c0_0 = arith.constant 0 : index
    %0 = vector.load %arg1[%c0, %c0_0] : memref<1x2048xf32, #tpu.memory_space<vmem>>, vector<1x2048xf32>
    %c0_1 = arith.constant 0 : index
    %c0_2 = arith.constant 0 : index
    %1 = vector.load %arg2[%c0_1, %c0_2] : memref<1x2048xf32, #tpu.memory_space<vmem>>, vector<1x2048xf32>
    tpu.vector_store %arg2[%c0_1, %c0_2], %0 {strides = array<i32>} : memref<1x2048xf32, #tpu.memory_space<vmem>>, vector<1x2048xf32>,
    return
  }
  func.func @transform_0(%arg0: i32) -> (i32, i32) {
    %c0_i32 = arith.constant 0 : i32
    %c0_i32_0 = arith.constant 0 : i32
    return %arg0, %c0_i32 : i32, i32
  }
  func.func @transform_1(%arg0: i32) -> (i32, i32) {
    %c0_i32 = arith.constant 0 : i32
    %c0_i32_0 = arith.constant 0 : i32
    return %arg0, %c0_i32 : i32, i32
  }
}

</mosaic_0001>

<bundles_post_ra>
// kernel: tpu_custom_call.1
= control target key start
LH: loop header
LB: loop body
LE: loop exit
PB: predicated region body
PF: predicated region fallthrough
CT: control target
= control target key end

     0   :  { %6 = vsyncpa [#allocation3], 0  ;;  %s116_s0 = inlined_call_operand.hbm [shape: f32[1,2048], index: 0, kind: input, shape index: {}]   ;;  %s117_s1 = inlined_call_operand.hbm [shape: f32[1,2048], index: 1, kind: output, shape index: {}]  }
   0x1   :  { %7 = vsyncpa [#allocation4], 0  ;;  %s13_s8 = sshll.u32 %s116_s0, 4  ;;  %s98_s9 = smov [#allocation2]   ;;  %s14_s8 = int_to_ptr.hbm [resolvable:$true] %s13_s8 }
   0x2   :  { %s15_s10 = sshll.u32 %s98_s9, 4  ;;  %s16_s10 = int_to_ptr.vmem [resolvable:$true] %s15_s10 }
   0x3   :  { %18 = dma.hbm_to_vmem [thread:$0]  %s14_s8, 256, %s16_s10, [#allocation3]  }
   0x4   :  { %94 = dma.done.wait [#allocation3], 256  }
   0x5   :  { %95 = vsyncadd [#allocation3], 4294967040  ;;  %s99_s11 = smov [#allocation5]   ;;  %s34_s15 = sshll.u32 %s117_s1, 4  ;;  %v23_v0 = vld [vmem:[#allocation2] sm:$0xff]  ;;  %v24_v1 = vld [vmem:[#allocation2 + $0x8] sm:$0xff]  ;;  %s35_s15 = int_to_ptr.hbm [resolvable:$true] %s34_s15 }
   0x6   :  { %s32_s12 = sshll.u32 %s99_s11, 4  ;;  %25 = vst [vmem:[#allocation5] sm:$0xff] %v23_v0  ;;  %s33_s12 = int_to_ptr.vmem [resolvable:$true] %s32_s12 }
   0x7   :  { %26 = vst [vmem:[#allocation5 + $0x8] sm:$0xff] %v24_v1 }
   0x8   :  { %37 = dma.vmem_to_hbm [thread:$0]  %s33_s12, 256, %s35_s15, [#allocation4]  }
   0x9   :  { %96 = dma.done.wait [#allocation4], 256  }
   0xa   :  { %97 = vsyncadd [#allocation4], 4294967040 }
   0xb   :  { %42 = vsyncpa [#allocation3], 1 }
   0xc   :  { %43 = vsyncpa [#allocation4], 1 }

</bundles_post_ra>
